<compile_context>
chip_gen: v7x
topology: tpu7x:2x2x1
jax: 0.10.0
libtpu: 0.0.40
codegen_flags: <defaults>
</compile_context>

<pallas_src>
import functools

import numpy as np
import jax
import jax.numpy as jnp
from jax import lax
from jax.experimental import pallas as pl
from jax.experimental.pallas import tpu as pltpu

N_CLASSES = 5
LAMBD = 10.0


def _build_cost_matrix(n_classes: int, exp: int = 2) -> np.ndarray:
    # Same as the module __init__ (mode=1 path).
    x = np.abs(np.arange(n_classes, dtype=np.float32))
    M = np.abs(x[:, np.newaxis] - x[np.newaxis, :]) ** exp
    M /= M.max()
    return M.astype(np.float32)


def _cs_reg_loss_kernel(logits_ref, tgt_ref, out_ref, acc_ref, *,
                        n_classes, batch, lambd, inv_batch, m_const):
    """Fused CE + lambd * cost-sensitive term, batch on the lane axis.

    logits_ref : (C, tb)  logits tile (batch on lanes), any float dtype
    tgt_ref    : (1, tb)  int32 target ids
    out_ref    : (1, 1)   f32 SMEM scalar output
    acc_ref    : (1, tb)  f32 VMEM per-lane accumulator (persists across grid)
    """
    i = pl.program_id(0)
    tb = logits_ref.shape[1]

    @pl.when(i == 0)
    def _init():
        acc_ref[...] = jnp.zeros_like(acc_ref)

    # Tail-tile mask: global batch index of each lane in this tile.
    lane = lax.broadcasted_iota(jnp.int32, (1, tb), 1)
    valid = (i * tb + lane) < batch                       # (1, tb) bool

    tgt = tgt_ref[...]                                    # (1, tb) int32
    logits = logits_ref[...].astype(jnp.float32)          # (C, tb)

    # Per-class rows as (1, tb); zero garbage lanes so exp can't make NaN/Inf.
    rows = [jnp.where(valid, logits[c:c + 1, :], 0.0) for c in range(n_classes)]

    # Unrolled class reductions on the VPU (C is a tiny compile-time constant).
    mx = rows[0]
    for c in range(1, n_classes):
        mx = jnp.maximum(mx, rows[c])

    eqs = [tgt == c for c in range(n_classes)]            # one-hot comparisons

    z = [r - mx for r in rows]
    ez = [jnp.exp(zc) for zc in z]                        # single exp pass
    denom = ez[0]
    for c in range(1, n_classes):
        denom = denom + ez[c]

    # z at the target class (gather via unrolled selects).
    z_tgt = jnp.zeros_like(mx)
    for c in range(n_classes):
        z_tgt = jnp.where(eqs[c], z[c], z_tgt)

    # Cost-sensitive numerator: sum_c M[target, c] * exp(z_c), with the 5x5
    # cost matrix baked in as compile-time constants (no m_rows input stream).
    cs_num = jnp.zeros_like(mx)
    for t in range(n_classes):
        s_t = None
        for c in range(n_classes):
            m = m_const[t][c]
            if m == 0.0:
                continue
            term = ez[c] if m == 1.0 else jnp.float32(m) * ez[c]
            s_t = term if s_t is None else s_t + term
        if s_t is None:
            continue
        cs_num = jnp.where(eqs[t], s_t, cs_num)

    # -log_softmax[target] = log(denom) - z_tgt ;  cs = cs_num / denom (exact).
    contrib = jnp.log(denom) - z_tgt + jnp.float32(lambd) * (cs_num / denom)
    acc_ref[...] += jnp.where(valid, contrib, 0.0)

    @pl.when(i == pl.num_programs(0) - 1)
    def _finalize():
        out_ref[0, 0] = jnp.sum(acc_ref[...]) * jnp.float32(inv_batch)


def cost_sensitive_regularized_loss(logits, target, M=None, *,
                                    lambd=LAMBD, tile_b=4096):
    """logits: (B, C) float, target: (B,) int class ids, M: (C, C) cost matrix."""
    B, C = logits.shape
    if M is None:
        M = _build_cost_matrix(C)
    m_const = tuple(tuple(float(v) for v in row)
                    for row in np.asarray(M, dtype=np.float32))

    # Batch-on-lanes layout. Keep the input dtype (bf16 stays bf16 over HBM).
    logits_t = jnp.transpose(logits)                      # (C, B)
    tgt = target.astype(jnp.int32).reshape(1, B)          # (1, B)

    if B <= tile_b:
        tb = B                     # single tile; block == full array, no padding
    else:
        tb = max(128, (int(tile_b) // 128) * 128)
    num_tiles = (B + tb - 1) // tb                        # tail tile masked in-kernel

    kernel = functools.partial(
        _cs_reg_loss_kernel,
        n_classes=C, batch=B, lambd=float(lambd), inv_batch=1.0 / float(B),
        m_const=m_const)

    out = pl.pallas_call(
        kernel,
        out_shape=jax.ShapeDtypeStruct((1, 1), jnp.float32),
        grid=(num_tiles,),
        in_specs=[
            pl.BlockSpec((C, tb), lambda i: (0, i)),      # logits (C, tile)
            pl.BlockSpec((1, tb), lambda i: (0, i)),      # targets (1, tile)
        ],
        out_specs=pl.BlockSpec(memory_space=pltpu.MemorySpace.SMEM),
        scratch_shapes=[pltpu.VMEM((1, tb), jnp.float32)],
        compiler_params=pltpu.CompilerParams(
            dimension_semantics=("arbitrary",),
        ),
    )(logits_t, tgt)
    return out[0, 0]


def _reference(logits, target, M, lambd=LAMBD):
    # Pure-JAX reference of the PyTorch forward (reduction='mean', base_loss='ce').
    lg = logits.astype(jnp.float32)
    logp = jax.nn.log_softmax(lg, axis=1)
    base_l = jnp.mean(-jnp.take_along_axis(logp, target[:, None], axis=1)[:, 0])
    preds = jax.nn.softmax(lg, axis=1)
    cs = jnp.sum(jnp.asarray(M, jnp.float32)[target, :] * preds, axis=-1)
    return base_l + lambd * jnp.mean(cs)


if __name__ == "__main__":
    key = jax.random.PRNGKey(0)
    M = _build_cost_matrix(N_CLASSES, exp=2)

    # Small canonical case (single tile, block == full array).
    B = 8
    k1, k2 = jax.random.split(key)
    logits = jax.random.normal(k1, (B, N_CLASSES), dtype=jnp.float32)
    target = jax.random.randint(k2, (B,), 0, N_CLASSES, dtype=jnp.int32)

    out = jax.block_until_ready(
        cost_sensitive_regularized_loss(logits, target, M, lambd=LAMBD))
    ref = _reference(logits, target, M, lambd=LAMBD)
    assert jnp.allclose(out, ref, rtol=1e-5, atol=1e-5), (out, ref)

    # Multi-tile case: exercises the grid accumulator and in-kernel tail masking
    # (B=300 with 128-wide tiles -> 3 grid steps, no wrapper padding).
    B2 = 300
    k3, k4 = jax.random.split(k2)
    logits2 = jax.random.normal(k3, (B2, N_CLASSES), dtype=jnp.float32)
    target2 = jax.random.randint(k4, (B2,), 0, N_CLASSES, dtype=jnp.int32)

    out2 = jax.block_until_ready(
        cost_sensitive_regularized_loss(logits2, target2, M, lambd=LAMBD,
                                        tile_b=128))
    ref2 = _reference(logits2, target2, M, lambd=LAMBD)
    assert jnp.allclose(out2, ref2, rtol=1e-5, atol=1e-5), (out2, ref2)

    print("KERNEL_OK")
</pallas_src>

<mosaic_0001>
module attributes {stable_mosaic.version = 11 : i64} {
  func.func @_cs_reg_loss_kernel(%arg0: i32, %arg1: memref<5x8xf32, #tpu.memory_space<vmem>>, %arg2: memref<1x8xi32, #tpu.memory_space<vmem>>, %arg3: memref<1x1xf32, #tpu.memory_space<smem>>, %arg4: memref<1x8xf32, #tpu.memory_space<vmem>>) attributes {dimension_semantics = [#tpu.dimension_semantics<arbitrary>], iteration_bounds = array<i64: 1>, scalar_prefetch = 0 : i64, scratch_operands = 1 : i64, tpu.core_type = #tpu.core_type<tc>, window_params = [{transform_indices = @transform_0, window_bounds = array<i64: 5, 8>}, {transform_indices = @transform_1, window_bounds = array<i64: 1, 8>}, {transform_indices = @transform_2, window_bounds = array<i64: 1, 1>}]} {
    %c0_i32 = arith.constant 0 : i32
    %0 = arith.cmpi eq, %arg0, %c0_i32 : i32
    %1 = arith.extui %0 : i1 to i32
    %c0_i32_0 = arith.constant 0 : i32
    %2 = arith.cmpi ne, %1, %c0_i32_0 : i32
    scf.if %2 {
      %cst_38 = arith.constant 0.000000e+00 : f32
      %131 = vector.broadcast %cst_38 : f32 to vector<1x8xf32>
      %c0_39 = arith.constant 0 : index
      %c0_40 = arith.constant 0 : index
      %132 = vector.load %arg4[%c0_39, %c0_40] : memref<1x8xf32, #tpu.memory_space<vmem>>, vector<1x8xf32>
      tpu.vector_store %arg4[%c0_39, %c0_40], %131 {strides = array<i32>} : memref<1x8xf32, #tpu.memory_space<vmem>>, vector<1x8xf32>,
    } else {
    }
    %3 = tpu.iota {dimensions = array<i32: 1>} : vector<1x8xi32>
    %c8_i32 = arith.constant 8 : i32
    %4 = arith.muli %arg0, %c8_i32 : i32
    %5 = vector.broadcast %4 : i32 to vector<1x8xi32>
    %6 = arith.addi %5, %3 : vector<1x8xi32>
    %c8_i32_1 = arith.constant 8 : i32
    %7 = vector.broadcast %c8_i32_1 : i32 to vector<1x8xi32>
    %8 = arith.cmpi slt, %6, %7 : vector<1x8xi32>
    %c0 = arith.constant 0 : index
    %c0_2 = arith.constant 0 : index
    %9 = vector.load %arg2[%c0, %c0_2] : memref<1x8xi32, #tpu.memory_space<vmem>>, vector<1x8xi32>
    %c0_3 = arith.constant 0 : index
    %c0_4 = arith.constant 0 : index
    %10 = vector.load %arg1[%c0_3, %c0_4] : memref<5x8xf32, #tpu.memory_space<vmem>>, vector<5x8xf32>
    %11 = vector.extract_strided_slice %10 {offsets = [0, 0], sizes = [1, 8], strides = [1, 1]} : vector<5x8xf32> to vector<1x8xf32>
    %cst = arith.constant 0.000000e+00 : f32
    %12 = vector.broadcast %cst : f32 to vector<1x8xf32>
    %13 = arith.select %8, %11, %12 : vector<1x8xi1>, vector<1x8xf32>
    %14 = vector.extract_strided_slice %10 {offsets = [1, 0], sizes = [1, 8], strides = [1, 1]} : vector<5x8xf32> to vector<1x8xf32>
    %cst_5 = arith.constant 0.000000e+00 : f32
    %15 = vector.broadcast %cst_5 : f32 to vector<1x8xf32>
    %16 = arith.select %8, %14, %15 : vector<1x8xi1>, vector<1x8xf32>
    %17 = vector.extract_strided_slice %10 {offsets = [2, 0], sizes = [1, 8], strides = [1, 1]} : vector<5x8xf32> to vector<1x8xf32>
    %cst_6 = arith.constant 0.000000e+00 : f32
    %18 = vector.broadcast %cst_6 : f32 to vector<1x8xf32>
    %19 = arith.select %8, %17, %18 : vector<1x8xi1>, vector<1x8xf32>
    %20 = vector.extract_strided_slice %10 {offsets = [3, 0], sizes = [1, 8], strides = [1, 1]} : vector<5x8xf32> to vector<1x8xf32>
    %cst_7 = arith.constant 0.000000e+00 : f32
    %21 = vector.broadcast %cst_7 : f32 to vector<1x8xf32>
    %22 = arith.select %8, %20, %21 : vector<1x8xi1>, vector<1x8xf32>
    %23 = vector.extract_strided_slice %10 {offsets = [4, 0], sizes = [1, 8], strides = [1, 1]} : vector<5x8xf32> to vector<1x8xf32>
    %cst_8 = arith.constant 0.000000e+00 : f32
    %24 = vector.broadcast %cst_8 : f32 to vector<1x8xf32>
    %25 = arith.select %8, %23, %24 : vector<1x8xi1>, vector<1x8xf32>
    %26 = arith.maximumf %13, %16 : vector<1x8xf32>
    %27 = arith.maximumf %26, %19 : vector<1x8xf32>
    %28 = arith.maximumf %27, %22 : vector<1x8xf32>
    %29 = arith.maximumf %28, %25 : vector<1x8xf32>
    %c0_i32_9 = arith.constant 0 : i32
    %30 = vector.broadcast %c0_i32_9 : i32 to vector<1x8xi32>
    %31 = arith.cmpi eq, %9, %30 : vector<1x8xi32>
    %c1_i32 = arith.constant 1 : i32
    %32 = vector.broadcast %c1_i32 : i32 to vector<1x8xi32>
    %33 = arith.cmpi eq, %9, %32 : vector<1x8xi32>
    %c2_i32 = arith.constant 2 : i32
    %34 = vector.broadcast %c2_i32 : i32 to vector<1x8xi32>
    %35 = arith.cmpi eq, %9, %34 : vector<1x8xi32>
    %c3_i32 = arith.constant 3 : i32
    %36 = vector.broadcast %c3_i32 : i32 to vector<1x8xi32>
    %37 = arith.cmpi eq, %9, %36 : vector<1x8xi32>
    %c4_i32 = arith.constant 4 : i32
    %38 = vector.broadcast %c4_i32 : i32 to vector<1x8xi32>
    %39 = arith.cmpi eq, %9, %38 : vector<1x8xi32>
    %40 = arith.subf %13, %29 : vector<1x8xf32>
    %41 = arith.subf %16, %29 : vector<1x8xf32>
    %42 = arith.subf %19, %29 : vector<1x8xf32>
    %43 = arith.subf %22, %29 : vector<1x8xf32>
    %44 = arith.subf %25, %29 : vector<1x8xf32>
    %45 = math.exp %40 : vector<1x8xf32>
    %46 = math.exp %41 : vector<1x8xf32>
    %47 = math.exp %42 : vector<1x8xf32>
    %48 = math.exp %43 : vector<1x8xf32>
    %49 = math.exp %44 : vector<1x8xf32>
    %50 = arith.addf %45, %46 : vector<1x8xf32>
    %51 = arith.addf %50, %47 : vector<1x8xf32>
    %52 = arith.addf %51, %48 : vector<1x8xf32>
    %53 = arith.addf %52, %49 : vector<1x8xf32>
    %cst_10 = arith.constant 0.000000e+00 : f32
    %54 = vector.broadcast %cst_10 : f32 to vector<1x8xf32>
    %55 = arith.select %31, %40, %54 : vector<1x8xi1>, vector<1x8xf32>
    %56 = arith.select %33, %41, %55 : vector<1x8xi1>, vector<1x8xf32>
    %57 = arith.select %35, %42, %56 : vector<1x8xi1>, vector<1x8xf32>
    %58 = arith.select %37, %43, %57 : vector<1x8xi1>, vector<1x8xf32>
    %59 = arith.select %39, %44, %58 : vector<1x8xi1>, vector<1x8xf32>
    %cst_11 = arith.constant 0.000000e+00 : f32
    %60 = vector.broadcast %cst_11 : f32 to vector<1x8xf32>
    %cst_12 = arith.constant 6.250000e-02 : f32
    %61 = vector.broadcast %cst_12 : f32 to vector<1x8xf32>
    %62 = arith.mulf %61, %46 : vector<1x8xf32>
    %cst_13 = arith.constant 2.500000e-01 : f32
    %63 = vector.broadcast %cst_13 : f32 to vector<1x8xf32>
    %64 = arith.mulf %63, %47 : vector<1x8xf32>
    %65 = arith.addf %62, %64 : vector<1x8xf32>
    %cst_14 = arith.constant 5.625000e-01 : f32
    %66 = vector.broadcast %cst_14 : f32 to vector<1x8xf32>
    %67 = arith.mulf %66, %48 : vector<1x8xf32>
    %68 = arith.addf %65, %67 : vector<1x8xf32>
    %69 = arith.addf %68, %49 : vector<1x8xf32>
    %70 = arith.select %31, %69, %60 : vector<1x8xi1>, vector<1x8xf32>
    %cst_15 = arith.constant 6.250000e-02 : f32
    %71 = vector.broadcast %cst_15 : f32 to vector<1x8xf32>
    %72 = arith.mulf %71, %45 : vector<1x8xf32>
    %cst_16 = arith.constant 6.250000e-02 : f32
    %73 = vector.broadcast %cst_16 : f32 to vector<1x8xf32>
    %74 = arith.mulf %73, %47 : vector<1x8xf32>
    %75 = arith.addf %72, %74 : vector<1x8xf32>
    %cst_17 = arith.constant 2.500000e-01 : f32
    %76 = vector.broadcast %cst_17 : f32 to vector<1x8xf32>
    %77 = arith.mulf %76, %48 : vector<1x8xf32>
    %78 = arith.addf %75, %77 : vector<1x8xf32>
    %cst_18 = arith.constant 5.625000e-01 : f32
    %79 = vector.broadcast %cst_18 : f32 to vector<1x8xf32>
    %80 = arith.mulf %79, %49 : vector<1x8xf32>
    %81 = arith.addf %78, %80 : vector<1x8xf32>
    %82 = arith.select %33, %81, %70 : vector<1x8xi1>, vector<1x8xf32>
    %cst_19 = arith.constant 2.500000e-01 : f32
    %83 = vector.broadcast %cst_19 : f32 to vector<1x8xf32>
    %84 = arith.mulf %83, %45 : vector<1x8xf32>
    %cst_20 = arith.constant 6.250000e-02 : f32
    %85 = vector.broadcast %cst_20 : f32 to vector<1x8xf32>
    %86 = arith.mulf %85, %46 : vector<1x8xf32>
    %87 = arith.addf %84, %86 : vector<1x8xf32>
    %cst_21 = arith.constant 6.250000e-02 : f32
    %88 = vector.broadcast %cst_21 : f32 to vector<1x8xf32>
    %89 = arith.mulf %88, %48 : vector<1x8xf32>
    %90 = arith.addf %87, %89 : vector<1x8xf32>
    %cst_22 = arith.constant 2.500000e-01 : f32
    %91 = vector.broadcast %cst_22 : f32 to vector<1x8xf32>
    %92 = arith.mulf %91, %49 : vector<1x8xf32>
    %93 = arith.addf %90, %92 : vector<1x8xf32>
    %94 = arith.select %35, %93, %82 : vector<1x8xi1>, vector<1x8xf32>
    %cst_23 = arith.constant 5.625000e-01 : f32
    %95 = vector.broadcast %cst_23 : f32 to vector<1x8xf32>
    %96 = arith.mulf %95, %45 : vector<1x8xf32>
    %cst_24 = arith.constant 2.500000e-01 : f32
    %97 = vector.broadcast %cst_24 : f32 to vector<1x8xf32>
    %98 = arith.mulf %97, %46 : vector<1x8xf32>
    %99 = arith.addf %96, %98 : vector<1x8xf32>
    %cst_25 = arith.constant 6.250000e-02 : f32
    %100 = vector.broadcast %cst_25 : f32 to vector<1x8xf32>
    %101 = arith.mulf %100, %47 : vector<1x8xf32>
    %102 = arith.addf %99, %101 : vector<1x8xf32>
    %cst_26 = arith.constant 6.250000e-02 : f32
    %103 = vector.broadcast %cst_26 : f32 to vector<1x8xf32>
    %104 = arith.mulf %103, %49 : vector<1x8xf32>
    %105 = arith.addf %102, %104 : vector<1x8xf32>
    %106 = arith.select %37, %105, %94 : vector<1x8xi1>, vector<1x8xf32>
    %cst_27 = arith.constant 5.625000e-01 : f32
    %107 = vector.broadcast %cst_27 : f32 to vector<1x8xf32>
    %108 = arith.mulf %107, %46 : vector<1x8xf32>
    %109 = arith.addf %45, %108 : vector<1x8xf32>
    %cst_28 = arith.constant 2.500000e-01 : f32
    %110 = vector.broadcast %cst_28 : f32 to vector<1x8xf32>
    %111 = arith.mulf %110, %47 : vector<1x8xf32>
    %112 = arith.addf %109, %111 : vector<1x8xf32>
    %cst_29 = arith.constant 6.250000e-02 : f32
    %113 = vector.broadcast %cst_29 : f32 to vector<1x8xf32>
    %114 = arith.mulf %113, %48 : vector<1x8xf32>
    %115 = arith.addf %112, %114 : vector<1x8xf32>
    %116 = arith.select %39, %115, %106 : vector<1x8xi1>, vector<1x8xf32>
    %117 = math.log %53 : vector<1x8xf32>
    %118 = arith.subf %117, %59 : vector<1x8xf32>
    %119 = arith.divf %116, %53 : vector<1x8xf32>
    %cst_30 = arith.constant 1.000000e+01 : f32
    %120 = vector.broadcast %cst_30 : f32 to vector<1x8xf32>
    %121 = arith.mulf %120, %119 : vector<1x8xf32>
    %122 = arith.addf %118, %121 : vector<1x8xf32>
    %c0_31 = arith.constant 0 : index
    %c0_32 = arith.constant 0 : index
    %123 = vector.load %arg4[%c0_31, %c0_32] : memref<1x8xf32, #tpu.memory_space<vmem>>, vector<1x8xf32>
    %cst_33 = arith.constant 0.000000e+00 : f32
    %124 = vector.broadcast %cst_33 : f32 to vector<1x8xf32>
    %125 = arith.select %8, %122, %124 : vector<1x8xi1>, vector<1x8xf32>
    %126 = arith.addf %123, %125 : vector<1x8xf32>
    %c0_34 = arith.constant 0 : index
    %c0_35 = arith.constant 0 : index
    %127 = vector.load %arg4[%c0_34, %c0_35] : memref<1x8xf32, #tpu.memory_space<vmem>>, vector<1x8xf32>
    tpu.vector_store %arg4[%c0_34, %c0_35], %126 {strides = array<i32>} : memref<1x8xf32, #tpu.memory_space<vmem>>, vector<1x8xf32>,
    %c0_i32_36 = arith.constant 0 : i32
    %128 = arith.cmpi eq, %arg0, %c0_i32_36 : i32
    %129 = arith.extui %128 : i1 to i32
    %c0_i32_37 = arith.constant 0 : i32
    %130 = arith.cmpi ne, %129, %c0_i32_37 : i32
    scf.if %130 {
      %c0_38 = arith.constant 0 : index
      %c0_39 = arith.constant 0 : index
      %131 = vector.load %arg4[%c0_38, %c0_39] : memref<1x8xf32, #tpu.memory_space<vmem>>, vector<1x8xf32>
      %132 = vector.shape_cast %131 : vector<1x8xf32> to vector<1x1x8xf32>
      %cst_40 = arith.constant dense<0.000000e+00> : vector<1xf32>
      %133 = vector.multi_reduction <add>, %132, %cst_40 [1, 2] : vector<1x1x8xf32> to vector<1xf32>
      %134 = vector.shape_cast %133 : vector<1xf32> to vector<1x1x1xf32>
      %135 = vector.extract %134[0, 0, 0] : f32 from vector<1x1x1xf32>
      %cst_41 = arith.constant 1.250000e-01 : f32
      %136 = arith.mulf %135, %cst_41 : f32
      %c0_42 = arith.constant 0 : index
      %c0_43 = arith.constant 0 : index
      %137 = memref.load %arg3[%c0_42, %c0_43] : memref<1x1xf32, #tpu.memory_space<smem>>
      memref.store %136, %arg3[%c0_42, %c0_43] : memref<1x1xf32, #tpu.memory_space<smem>>
    } else {
    }
    return
  }
  func.func @transform_0(%arg0: i32) -> (i32, i32) {
    %c0_i32 = arith.constant 0 : i32
    %c0_i32_0 = arith.constant 0 : i32
    return %c0_i32, %arg0 : i32, i32
  }
  func.func @transform_1(%arg0: i32) -> (i32, i32) {
    %c0_i32 = arith.constant 0 : i32
    %c0_i32_0 = arith.constant 0 : i32
    return %c0_i32, %arg0 : i32, i32
  }
  func.func @transform_2(%arg0: i32) -> (i32, i32) {
    %c0_i32 = arith.constant 0 : i32
    %c0_i32_0 = arith.constant 0 : i32
    %c0_i32_1 = arith.constant 0 : i32
    return %c0_i32, %c0_i32_0 : i32, i32
  }
}

</mosaic_0001>

<bundles_post_ra>
// kernel: tpu_custom_call.1
= control target key start
LH: loop header
LB: loop body
LE: loop exit
PB: predicated region body
PF: predicated region fallthrough
CT: control target
= control target key end

     0   :  { %7 = vsyncpa [#allocation4], 0  ;;  %s454_s0 = inlined_call_operand.hbm [shape: f32[5,8], index: 0, kind: input, shape index: {}]   ;;  %s455_s1 = inlined_call_operand.vmem [shape: s32[1,8], index: 1, kind: input, shape index: {}]   ;;  %s456_s2 = inlined_call_operand.hbm [shape: f32[1,1], index: 2, kind: output, shape index: {}]  }
   0x1   :  { %8 = vsyncpa [#allocation5], 0  ;;  %s358_s9 = smov [#allocation3]   ;;  %s322_s13 = scalar_lea.hbm %s454_s0, 128 }
   0x2   :  { %s15_s10 = sshll.u32 %s358_s9, 4  ;;  %p323_p0 = scmp.ne.s32.totalorder %s454_s0, %s322_s13  ;;  %s16_s10 = int_to_ptr.vmem [resolvable:$true] %s15_s10 }
   0x3   :  { %p326_p1 = scmp.lt.u32.totalorder %s322_s13, %s454_s0 }
   0x5   :  { %p328_p2 = pnand %p326_p1, %p323_p0 }
   0x7   :  { %331 = shalt.err (!%p328_p2)
}
   0x8   :  { %s332_s18 = scalar_lea.vmem %s16_s10, 128  ;;  %p337_p4 = scmp.lt.s32.totalorder %s16_s10, %s16_s10 }
   0x9   :  { %p333_p3 = scmp.ne.s32.totalorder %s16_s10, %s332_s18  ;;  %p338_p5 = scmp.lt.s32.totalorder %s332_s18, %s332_s18 }
   0xb   :  { %p339_p6 = por %p338_p5, %p337_p4 }
   0xd   :  { %p340_p7 = pnand %p339_p6, %p333_p3 }
   0xf   :  { %343 = shalt.err (!%p340_p7)
}
  0x10   :  { %18 = dma.hbm_to_vmem [thread:$0]  %s454_s0, 128, %s16_s10, [#allocation4]  }
  0x11   :  { %354 = dma.done.wait [#allocation4], 128  }
  0x12   :  { %355 = vsyncadd [#allocation4], 4294967168  ;;  %vm28_vm0 = vcmask 57344   ;;  %v30_v0 = vlaneseq  ;;  %v359_v1 = vmov 0.0   ;;  %v37_v3 = vld [vmem:[#allocation3] sm:$0x1f] }
  0x13   :  { %29 = vst.msk [vmem:[#allocation2] sm:$0x1] %vm28_vm0, %v359_v1  ;;  %v360_v12 = vmov 1966171168   ;;  %v404_v33 = vld [vmem:[%s455_s1] sm:$0x1] }
  0x14   :  { %v390_v2 = vand.u32 127, %v30_v0  ;;  %v100_v13 = vunpack.c.l.s4 %v360_v12  ;;  %v103_v21 = vshrl.u32 %v30_v0, 7  ;;  %vm52_vm2 = vcmp.eq.s32.totalorder %v404_v33, 0  ;;  %s344_s25 = scalar_lea.hbm %s456_s2, 16 }
  0x15   :  { %vm53_vm3 = vcmp.eq.s32.totalorder %v404_v33, 1  ;;  %vm54_vm4 = vcmp.eq.s32.totalorder %v404_v33, 2  ;;  %vm55_vm5 = vcmp.eq.s32.totalorder %v404_v33, 3  ;;  %vm56_vm6 = vcmp.eq.s32.totalorder %v404_v33, 4  ;;  %p345_p8 = scmp.ne.s32.totalorder %s456_s2, %s344_s25  ;;  %p348_p9 = scmp.lt.u32.totalorder %s344_s25, %s456_s2 }
  0x16   :  { %vm35_vm1 = vcmp.lt.s32.totalorder %v390_v2, 8  ;;  %v101_v20 = vunpack.c.0.s8 %v100_v13 }
  0x17   :  { %v38_v4 = vsel %vm35_vm1, %v37_v3, 0.0  ;;  %p350_p10 = pnand %p348_p9, %p345_p8 }
  0x18   :  { %v40_v5 = vrot.slane %v38_v4, 1  ;;  %v43_v6 = vrot.slane %v38_v4, 2  ;;  %v46_v8 = vrot.slane %v38_v4, 3  ;;  %v49_v10 = vrot.slane %v38_v4, 4 }
  0x19   :  { %v398_v31 = vsub.s32 %v101_v20, %v103_v21 }
  0x1a   :  { %v42_v7 = vmax.f32 %v38_v4, %v40_v5 }
  0x1c   :  { %v45_v9 = vmax.f32 %v42_v7, %v43_v6 }
  0x1e   :  { %v48_v11 = vmax.f32 %v45_v9, %v46_v8 }
  0x20   :  { %v51_v14 = vmax.f32 %v48_v11, %v49_v10 }
  0x22   :  { %v57_v15 = vsub.f32 %v38_v4, %v51_v14  ;;  %v59_v16 = vrot.slane %v51_v14, 7  ;;  %v62_v17 = vrot.slane %v51_v14, 6  ;;  %v65_v18 = vrot.slane %v51_v14, 5 }
  0x23   :  { %v68_v19 = vrot.slane %v51_v14, 4 }
  0x24   :  { %v61_v22 = vsub.f32 %v38_v4, %v59_v16  ;;  %v64_v23 = vsub.f32 %v38_v4, %v62_v17  ;;  %v67_v24 = vsub.f32 %v38_v4, %v65_v18  ;;  %v71_v25 = vmul.f32 1.442695, %v57_v15 }
  0x25   :  { %v395_v26 = vsub.f32 %v38_v4, %v68_v19  ;;  %v97_v38 = vsel %vm52_vm2, %v57_v15, 0.0 }
  0x26   :  { %v73_v27 = vmul.f32 1.442695, %v61_v22  ;;  %v75_v28 = vmul.f32 1.442695, %v64_v23  ;;  %v77_v29 = vmul.f32 1.442695, %v67_v24  ;;  %308 = vpow2.f32 %v71_v25 }
  0x27   :  { %v79_v30 = vmul.f32 1.442695, %v395_v26  ;;  %v105_v32 = vrot.slane %v61_v22, %v398_v31  ;;  %v123_v35 = vrot.slane %v64_v23, %v398_v31  ;;  %v141_v36 = vrot.slane %v67_v24, %v398_v31 }
  0x28   :  { %310 = vpow2.f32 %v73_v27  ;;  %v154_v39 = vcombine.high %v395_v26, %v395_v26 }
  0x29   :  { %312 = vpow2.f32 %v75_v28  ;;  %v106_v34 = vcombine.high %v105_v32, %v105_v32  ;;  %v415_v42 = vrot.slane %v123_v35, %v398_v31  ;;  %v142_v43 = vcombine.high %v141_v36, %v141_v36 }
  0x2a   :  { %314 = vpow2.f32 %v77_v29  ;;  %v161_v32 = vrot.slane %v154_v39, %v398_v31 }
  0x2b   :  { %316 = vpow2.f32 %v79_v30  ;;  %v113_v41 = vrot.slane %v106_v34, %v398_v31  ;;  %v131_v13 = vcombine.high %v415_v42, %v415_v42  ;;  %v149_v18 = vrot.slane %v142_v43, %v398_v31 }
  0x2d   :  { %v115_v21 = vsel %vm53_vm3, %v113_v41, %v97_v38  ;;  %v150_v36 = vcombine.high %v149_v18, %v149_v18 }
  0x2e   :  { %v133_v41 = vsel %vm54_vm4, %v131_v13, %v115_v21 }
  0x2f   :  { %v152_v39 = vsel %vm55_vm5, %v150_v36, %v133_v41 }
  0x30   :  { %v309_v37 = vpop.eup %308 }
  0x31   :  { %v203_v44 = vmul.f32 0.0625, %v309_v37  ;;  %v220_v48 = vmul.f32 0.25, %v309_v37  ;;  %v236_v49 = vmul.f32 0.5625, %v309_v37 }
  0x32   :  { %v311_v40 = vpop.eup %310 }
  0x33   :  { %v313_v45 = vpop.eup %312  ;;  %v82_v46 = vrot.slane %v311_v40, 1  ;;  %v171_v47 = vmul.f32 0.0625, %v311_v40  ;;  %v237_v54 = vmul.f32 0.25, %v311_v40  ;;  %v249_v63 = vmul.f32 0.5625, %v311_v40 }
  0x34   :  { %v315_v50 = vpop.eup %314  ;;  %v86_v51 = vrot.slane %v313_v45, 2  ;;  %v172_v52 = vmul.f32 0.25, %v313_v45  ;;  %v204_v53 = vmul.f32 0.0625, %v313_v45 }
  0x35   :  { %v317_v55 = vpop.eup %316  ;;  %v84_v56 = vadd.f32 %v309_v37, %v82_v46  ;;  %v90_v57 = vrot.slane %v315_v50, 3  ;;  %v177_v58 = vmul.f32 0.5625, %v315_v50  ;;  %v209_v59 = vmul.f32 0.25, %v315_v50 }
  0x36   :  { %v94_v60 = vrot.slane %v317_v55, 4  ;;  %v174_v61 = vrot.slane %v172_v52, 1  ;;  %v206_v62 = vrot.slane %v204_v53, 2  ;;  %v182_v3 = vrot.slane %v317_v55, 3 }
  0x37   :  { %v88_v0 = vadd.f32 %v86_v51, %v84_v56  ;;  %v179_v1 = vrot.slane %v177_v58, 2  ;;  %v211_v4 = vrot.slane %v209_v59, 3  ;;  %v214_v6 = vmul.f32 0.5625, %v317_v55  ;;  %v266_v59 = vld [vmem:[#allocation2] sm:$0x1] }
  0x38   :  { %v176_v5 = vadd.f32 %v174_v61, %v171_v47  ;;  %v222_v7 = vrot.slane %v171_v47, 1  ;;  %v225_v8 = vmul.f32 0.0625, %v315_v50  ;;  %v208_v10 = vadd.f32 %v206_v62, %v203_v44 }
  0x39   :  { %v92_v9 = vadd.f32 %v90_v57, %v88_v0  ;;  %v230_v11 = vmul.f32 0.25, %v317_v55  ;;  %v239_v12 = vrot.slane %v237_v54, 1  ;;  %v243_v20 = vmul.f32 0.0625, %v317_v55 }
  0x3a   :  { %v181_v14 = vadd.f32 %v179_v1, %v176_v5  ;;  %v224_v15 = vadd.f32 %v222_v7, %v220_v48  ;;  %v227_v16 = vrot.slane %v225_v8, 3  ;;  %v216_v23 = vrot.slane %v214_v6, 4 }
  0x3b   :  { %v96_v17 = vadd.f32 %v94_v60, %v92_v9  ;;  %v241_v19 = vadd.f32 %v239_v12, %v236_v49  ;;  %v251_v24 = vrot.slane %v249_v63, 1  ;;  %v213_v25 = vadd.f32 %v211_v4, %v208_v10 }
  0x3c   :  { %v184_v22 = vadd.f32 %v182_v3, %v181_v14  ;;  %v232_v26 = vrot.slane %v230_v11, 4  ;;  %v254_v27 = vrot.slane %v172_v52, 2  ;;  %v229_v29 = vadd.f32 %v227_v16, %v224_v15 }
  0x3d   :  { %318 = vlog2.f32 %v96_v17  ;;  %v253_v30 = vadd.f32 %v309_v37, %v251_v24  ;;  %v242_v34 = vadd.f32 %v241_v19, %v206_v62  ;;  %v245_v35 = vrot.slane %v243_v20, 4 }
  0x3e   :  { %v192_v28 = vrot.slane %v184_v22, %v398_v31  ;;  %320 = vrcp.f32 %v96_v17  ;;  %v218_v42 = vadd.f32 %v216_v23, %v213_v25  ;;  %v234_v44 = vadd.f32 %v232_v26, %v229_v29 }
  0x3f   :  { %v256_v40 = vadd.f32 %v254_v27, %v253_v30  ;;  %v168_v37 = vrot.slane %v161_v32, %v398_v31  ;;  %v247_v45 = vadd.f32 %v245_v35, %v242_v34 }
  0x40   :  { %v193_v38 = vcombine.high %v192_v28, %v192_v28 }
  0x41   :  { %v257_v47 = vadd.f32 %v256_v40, %v227_v16  ;;  %v170_v51 = vsel %vm56_vm6, %v168_v37, %v152_v39 }
  0x42   :  { %v200_v43 = vrot.slane %v193_v38, %v398_v31 }
  0x44   :  { %v202_v46 = vsel %vm52_vm2, %v200_v43, 0.0 }
  0x45   :  { %v219_v48 = vsel %vm53_vm3, %v218_v42, %v202_v46 }
  0x46   :  { %v235_v49 = vsel %vm54_vm4, %v234_v44, %v219_v48 }
  0x47   :  { %v319_v50 = vpop.eup %318  ;;  %v248_v52 = vsel %vm55_vm5, %v247_v45, %v235_v49 }
  0x48   :  { %v321_v53 = vpop.eup %320  ;;  %v258_v54 = vsel %vm56_vm6, %v257_v47, %v248_v52  ;;  %v260_v31 = vmul.f32 0.6931472, %v319_v50 }
  0x49   :  { %v263_v55 = vmul.f32 %v321_v53, %v258_v54 }
  0x4a   :  { %v261_v56 = vsub.f32 %v260_v31, %v170_v51 }
  0x4b   :  { %v264_v57 = vmul.f32 10.0, %v263_v55 }
  0x4d   :  { %v265_v58 = vadd.f32 %v264_v57, %v261_v56 }
  0x4f   :  { %v267_v60 = vsel %vm35_vm1, %v265_v58, 0.0 }
  0x50   :  { %v268_v61 = vadd.f32 %v267_v60, %v266_v59 }
  0x52   :  { %270 = vst.msk [vmem:[#allocation2] sm:$0x1] %vm28_vm0, %v268_v61 }
  0x59   :  { %v274_v62 = vld [vmem:[#allocation2] sm:$0x1] }
  0x5a   :  { %v275_v33 = vsel %vm28_vm0, %v274_v62, 0.0 }
  0x5b   :  { %276 = vadd.xlane.f32.xlu0 %v275_v33 }
  0xe8   :  { %v277_v63 = vpop.xlane.xlu0 %276 }
  0xe9   :  { %v278_v0 = vrot.slane %v277_v63, 4 }
  0xeb   :  { %v279_v1 = vadd.f32 %v278_v0, %v277_v63 }
  0xed   :  { %v280_v3 = vrot.slane %v279_v1, 2 }
  0xef   :  { %v281_v4 = vadd.f32 %v280_v3, %v279_v1 }
  0xf1   :  { %v282_v5 = vrot.slane %v281_v4, 1 }
  0xf3   :  { %v283_v6 = vadd.f32 %v282_v5, %v281_v4 }
  0xf5   :  { %302 = vpush %v283_v6 }
 0x126   :  { %s303_s1 = spop %302 }
 0x127   :  { %s285_s22 = smul.f32 0.125, %s303_s1 }
 0x129   :  { %287 = sst [smem:[#allocation6]] %s285_s22 }
 0x12a   :  { %353 = shalt.err (!%p350_p10)
}
 0x12b   :  { %s361_s30 = smov [#allocation6]  }
 0x12c   :  { %295 = dma.smem_to_hbm %s361_s30, 16, %s456_s2, [#allocation5]  }
 0x12d   :  { %356 = dma.done.wait [#allocation5], 16  }
 0x12e   :  { %357 = vsyncadd [#allocation5], 4294967280 }
 0x12f   :  { %299 = sfence }
 0x130   :  { %300 = vsyncpa [#allocation4], 1 }
 0x131   :  { %301 = vsyncpa [#allocation5], 1 }

</bundles_post_ra>
